<compile_context>
chip_gen: v6e
topology: v6e:2x2x1
jax: 0.10.0
libtpu: 0.0.40
codegen_flags: <defaults>
</compile_context>

<pallas_src>
import functools

import jax
import jax.numpy as jnp
from jax.experimental import pallas as pl
from jax.experimental.pallas import tpu as pltpu


def nn_policy_kernel(x_ref, w1_ref, b1_ref, w2_ref, b2_ref, o_ref):
    xT = x_ref[...]                  # (obs_dim, TB)  -- batch on lanes
    w1 = w1_ref[...]                 # (H, obs_dim)   == PyTorch l1.weight
    obs_dim = xT.shape[0]

    # ---- Layer 1 on the VPU: K=4 contraction as 4 broadcasted multiply-adds
    # (avoids paying the MXU push/pop latency for a 3%-utilized K dimension).
    h = w1[:, 0:1] * xT[0:1, :]                       # (H, TB)
    for k in range(1, obs_dim):                       # static unroll, obs_dim=4
        h = h + w1[:, k:k + 1] * xT[k:k + 1, :]
    h = jnp.maximum(h + b1_ref[...], 0.0)             # bias (H,1) lane-broadcast; ReLU

    # ---- Layer 2 on the MXU: (A,H) @ (H,TB), f32 accumulate.
    # TODO(synk): optionally cast w2/h to bf16 here for v6e/v7x MXU throughput
    # (kept f32 so the test tolerance stays tight; workload is overhead-bound).
    logits = jnp.dot(w2_ref[...], h, preferred_element_type=jnp.float32)
    logits = logits + b2_ref[...]                     # (A, TB), bias (A,1)

    # ---- 2-class softmax as a sigmoid difference (exactly equivalent math):
    #   p1 = exp(l1)/(exp(l0)+exp(l1)) = sigmoid(l1 - l0),  p0 = 1 - p1.
    d = logits[1:2, :] - logits[0:1, :]               # (1, TB)
    p1 = pl.reciprocal(1.0 + jnp.exp(-d), approx=True)  # EUP exp + EUP vrcp (free slot)
    p0 = 1.0 - p1
    # Two sublane-sliced stores into the lane-dense (A, TB) output block; the
    # lane axis (TB, multiple of 128) stays fully dense -> no vst.msk on lanes.
    o_ref[0:1, :] = p0.astype(o_ref.dtype)
    o_ref[1:2, :] = p1.astype(o_ref.dtype)


@functools.partial(jax.jit, static_argnames=("tb",))
def nn_policy_forward(x, w1, b1, w2, b2, *, tb=512):
    """x: (B, 4); w1: (H, 4); b1: (H,); w2: (2, H); b2: (2,). Returns (B, 2)."""
    B, obs_dim = x.shape
    H = w1.shape[0]
    A = w2.shape[0]
    assert A == 2, "sigmoid rewrite of the softmax assumes 2 actions"

    LANES = 128
    # Lane-dense batch tiling. Per batch column the live f32 footprint is
    # (obs_dim + H + A) * 4 B ~ 0.6 KB, so tb=512 double-buffered is far below
    # the default scoped VMEM limit and v7x's 64 MiB physical VMEM; re-check
    # this budget before raising tb on v5e/v6e (128 MiB).
    b_pad = pl.cdiv(B, LANES) * LANES        # round batch up to whole lanes
    tb = min(tb, b_pad)                       # don't tile wider than the data
    b_pad = pl.cdiv(b_pad, tb) * tb           # exact grid, no ragged edge blocks
    grid = (b_pad // tb,)

    xT = jnp.pad(x.T, ((0, 0), (0, b_pad - B)))   # (obs_dim, b_pad), zero-padded
    b1c = b1.reshape(H, 1)
    b2c = b2.reshape(A, 1)

    outT = pl.pallas_call(
        nn_policy_kernel,
        out_shape=jax.ShapeDtypeStruct((A, b_pad), jnp.float32),
        grid_spec=pltpu.PrefetchScalarGridSpec(
            num_scalar_prefetch=0,
            grid=grid,
            in_specs=[
                pl.BlockSpec((obs_dim, tb), lambda i: (0, i)),   # x^T: tiled over batch
                pl.BlockSpec((H, obs_dim), lambda i: (0, 0)),    # W1: VMEM-resident
                pl.BlockSpec((H, 1), lambda i: (0, 0)),          # b1: VMEM-resident
                pl.BlockSpec((A, H), lambda i: (0, 0)),          # W2: VMEM-resident
                pl.BlockSpec((A, 1), lambda i: (0, 0)),          # b2: VMEM-resident
            ],
            out_specs=pl.BlockSpec((A, tb), lambda i: (0, i)),   # lane-dense output slab
        ),
        compiler_params=pltpu.CompilerParams(
            # Independent batch tiles -> shard grid across TensorCores (2/chip on v7x).
            dimension_semantics=("parallel",),
        ),
    )(xT, w1, b1c, w2, b2c)

    return outT[:, :B].T                      # (B, A), PyTorch column order


def init_params(key, obs_dim=4, num_hidden=128, num_actions=2):
    # PyTorch nn.Linear default init: U(-1/sqrt(fan_in), 1/sqrt(fan_in)) for
    # both weight and bias; weight stored as (out_features, in_features).
    k1, k2, k3, k4 = jax.random.split(key, 4)
    bound1 = 1.0 / jnp.sqrt(obs_dim)
    bound2 = 1.0 / jnp.sqrt(num_hidden)
    w1 = jax.random.uniform(k1, (num_hidden, obs_dim), jnp.float32, -bound1, bound1)
    b1 = jax.random.uniform(k2, (num_hidden,), jnp.float32, -bound1, bound1)
    w2 = jax.random.uniform(k3, (num_actions, num_hidden), jnp.float32, -bound2, bound2)
    b2 = jax.random.uniform(k4, (num_actions,), jnp.float32, -bound2, bound2)
    return w1, b1, w2, b2


def reference_forward(x, w1, b1, w2, b2):
    h = jnp.maximum(x @ w1.T + b1, 0.0)
    logits = h @ w2.T + b2
    return jax.nn.softmax(logits, axis=-1)


if __name__ == "__main__":
    key = jax.random.PRNGKey(0)
    k_x, k_p = jax.random.split(key)

    OBS_DIM, HIDDEN, ACTIONS = 4, 128, 2
    w1, b1, w2, b2 = init_params(k_p, OBS_DIM, HIDDEN, ACTIONS)

    # Small batch (module-typical) plus one batch that exercises a multi-tile grid.
    for B in (8, 1024):
        x = jax.random.normal(jax.random.fold_in(k_x, B), (B, OBS_DIM), jnp.float32)
        out = jax.block_until_ready(nn_policy_forward(x, w1, b1, w2, b2))
        ref = reference_forward(x, w1, b1, w2, b2)

        assert out.shape == (B, ACTIONS)
        # approx=True reciprocal (EUP vrcp) trades a few ulps for a free EUP slot;
        # with approx=False this matches the f32 reference to ~1e-6, so the
        # tolerance below is loosened only for the approximate reciprocal.
        assert jnp.allclose(out, ref, atol=2e-3, rtol=2e-3)
        # p0 = 1 - p1 by construction -> rows sum to 1 to within ~1 ulp.
        assert jnp.allclose(jnp.sum(out, axis=-1), 1.0, atol=1e-5)

    print("KERNEL_OK")
</pallas_src>

<mosaic_0001>
module attributes {stable_mosaic.version = 11 : i64} {
  func.func @nn_policy_kernel(%arg0: i32, %arg1: memref<4x128xf32, #tpu.memory_space<vmem>>, %arg2: memref<128x4xf32, #tpu.memory_space<vmem>>, %arg3: memref<128x1xf32, #tpu.memory_space<vmem>>, %arg4: memref<2x128xf32, #tpu.memory_space<vmem>>, %arg5: memref<2x1xf32, #tpu.memory_space<vmem>>, %arg6: memref<2x128xf32, #tpu.memory_space<vmem>>) attributes {dimension_semantics = [#tpu.dimension_semantics<parallel>], iteration_bounds = array<i64: 1>, scalar_prefetch = 0 : i64, scratch_operands = 0 : i64, tpu.core_type = #tpu.core_type<tc>, window_params = [{transform_indices = @transform_0, window_bounds = array<i64: 4, 128>}, {pipeline_mode = #tpu.pipeline_mode<synchronous>, transform_indices = @transform_1, window_bounds = array<i64: 128, 4>}, {pipeline_mode = #tpu.pipeline_mode<synchronous>, transform_indices = @transform_2, window_bounds = array<i64: 128, 1>}, {pipeline_mode = #tpu.pipeline_mode<synchronous>, transform_indices = @transform_3, window_bounds = array<i64: 2, 128>}, {pipeline_mode = #tpu.pipeline_mode<synchronous>, transform_indices = @transform_4, window_bounds = array<i64: 2, 1>}, {transform_indices = @transform_5, window_bounds = array<i64: 2, 128>}]} {
    %c0 = arith.constant 0 : index
    %c0_0 = arith.constant 0 : index
    %0 = vector.load %arg1[%c0, %c0_0] : memref<4x128xf32, #tpu.memory_space<vmem>>, vector<4x128xf32>
    %c0_1 = arith.constant 0 : index
    %c0_2 = arith.constant 0 : index
    %1 = vector.load %arg2[%c0_1, %c0_2] : memref<128x4xf32, #tpu.memory_space<vmem>>, vector<128x4xf32>
    %2 = vector.extract_strided_slice %1 {offsets = [0, 0], sizes = [128, 1], strides = [1, 1]} : vector<128x4xf32> to vector<128x1xf32>
    %3 = vector.extract_strided_slice %0 {offsets = [0, 0], sizes = [1, 128], strides = [1, 1]} : vector<4x128xf32> to vector<1x128xf32>
    %4 = vector.broadcast %2 : vector<128x1xf32> to vector<128x128xf32>
    %5 = vector.broadcast %3 : vector<1x128xf32> to vector<128x128xf32>
    %6 = arith.mulf %4, %5 : vector<128x128xf32>
    %7 = vector.extract_strided_slice %1 {offsets = [0, 1], sizes = [128, 1], strides = [1, 1]} : vector<128x4xf32> to vector<128x1xf32>
    %8 = vector.extract_strided_slice %0 {offsets = [1, 0], sizes = [1, 128], strides = [1, 1]} : vector<4x128xf32> to vector<1x128xf32>
    %9 = vector.broadcast %7 : vector<128x1xf32> to vector<128x128xf32>
    %10 = vector.broadcast %8 : vector<1x128xf32> to vector<128x128xf32>
    %11 = arith.mulf %9, %10 : vector<128x128xf32>
    %12 = arith.addf %6, %11 : vector<128x128xf32>
    %13 = vector.extract_strided_slice %1 {offsets = [0, 2], sizes = [128, 1], strides = [1, 1]} : vector<128x4xf32> to vector<128x1xf32>
    %14 = vector.extract_strided_slice %0 {offsets = [2, 0], sizes = [1, 128], strides = [1, 1]} : vector<4x128xf32> to vector<1x128xf32>
    %15 = vector.broadcast %13 : vector<128x1xf32> to vector<128x128xf32>
    %16 = vector.broadcast %14 : vector<1x128xf32> to vector<128x128xf32>
    %17 = arith.mulf %15, %16 : vector<128x128xf32>
    %18 = arith.addf %12, %17 : vector<128x128xf32>
    %19 = vector.extract_strided_slice %1 {offsets = [0, 3], sizes = [128, 1], strides = [1, 1]} : vector<128x4xf32> to vector<128x1xf32>
    %20 = vector.extract_strided_slice %0 {offsets = [3, 0], sizes = [1, 128], strides = [1, 1]} : vector<4x128xf32> to vector<1x128xf32>
    %21 = vector.broadcast %19 : vector<128x1xf32> to vector<128x128xf32>
    %22 = vector.broadcast %20 : vector<1x128xf32> to vector<128x128xf32>
    %23 = arith.mulf %21, %22 : vector<128x128xf32>
    %24 = arith.addf %18, %23 : vector<128x128xf32>
    %c0_3 = arith.constant 0 : index
    %c0_4 = arith.constant 0 : index
    %25 = vector.load %arg3[%c0_3, %c0_4] : memref<128x1xf32, #tpu.memory_space<vmem>>, vector<128x1xf32>
    %26 = vector.broadcast %25 : vector<128x1xf32> to vector<128x128xf32>
    %27 = arith.addf %24, %26 : vector<128x128xf32>
    %cst = arith.constant 0.000000e+00 : f32
    %28 = vector.broadcast %cst : f32 to vector<128x128xf32>
    %29 = arith.maximumf %27, %28 : vector<128x128xf32>
    %c0_5 = arith.constant 0 : index
    %c0_6 = arith.constant 0 : index
    %30 = vector.load %arg4[%c0_5, %c0_6] : memref<2x128xf32, #tpu.memory_space<vmem>>, vector<2x128xf32>
    %cst_7 = arith.constant dense<0.000000e+00> : vector<2x128xf32>
    %31 = tpu.matmul %30, %29, %cst_7 {dimension_numbers = #tpu.dot_dimension_numbers<[1], [0], [0], [1], [0, 0, 1, 1], [], []>} : vector<2x128xf32>, vector<128x128xf32>, vector<2x128xf32> -> vector<2x128xf32>
    %c0_8 = arith.constant 0 : index
    %c0_9 = arith.constant 0 : index
    %32 = vector.load %arg5[%c0_8, %c0_9] : memref<2x1xf32, #tpu.memory_space<vmem>>, vector<2x1xf32>
    %33 = vector.broadcast %32 : vector<2x1xf32> to vector<2x128xf32>
    %34 = arith.addf %31, %33 : vector<2x128xf32>
    %35 = vector.extract_strided_slice %34 {offsets = [1, 0], sizes = [1, 128], strides = [1, 1]} : vector<2x128xf32> to vector<1x128xf32>
    %36 = vector.extract_strided_slice %34 {offsets = [0, 0], sizes = [1, 128], strides = [1, 1]} : vector<2x128xf32> to vector<1x128xf32>
    %37 = arith.subf %35, %36 : vector<1x128xf32>
    %cst_10 = arith.constant 0.000000e+00 : f32
    %38 = vector.broadcast %cst_10 : f32 to vector<1x128xf32>
    %39 = arith.subf %38, %37 : vector<1x128xf32>
    %40 = math.exp %39 : vector<1x128xf32>
    %cst_11 = arith.constant 1.000000e+00 : f32
    %41 = vector.broadcast %cst_11 : f32 to vector<1x128xf32>
    %42 = arith.addf %41, %40 : vector<1x128xf32>
    %43 = tpu.reciprocal %42 {approx = true} : vector<1x128xf32> -> vector<1x128xf32>
    %cst_12 = arith.constant 1.000000e+00 : f32
    %44 = vector.broadcast %cst_12 : f32 to vector<1x128xf32>
    %45 = arith.subf %44, %43 : vector<1x128xf32>
    %c0_13 = arith.constant 0 : index
    %c0_14 = arith.constant 0 : index
    %46 = vector.load %arg6[%c0_13, %c0_14] : memref<2x128xf32, #tpu.memory_space<vmem>>, vector<1x128xf32>
    tpu.vector_store %arg6[%c0_13, %c0_14], %45 {strides = array<i32>} : memref<2x128xf32, #tpu.memory_space<vmem>>, vector<1x128xf32>,
    %c1 = arith.constant 1 : index
    %c0_15 = arith.constant 0 : index
    %47 = vector.load %arg6[%c1, %c0_15] : memref<2x128xf32, #tpu.memory_space<vmem>>, vector<1x128xf32>
    tpu.vector_store %arg6[%c1, %c0_15], %43 {strides = array<i32>} : memref<2x128xf32, #tpu.memory_space<vmem>>, vector<1x128xf32>,
    return
  }
  func.func @transform_0(%arg0: i32) -> (i32, i32) {
    %c0_i32 = arith.constant 0 : i32
    %c0_i32_0 = arith.constant 0 : i32
    return %c0_i32, %arg0 : i32, i32
  }
  func.func @transform_1(%arg0: i32) -> (i32, i32) {
    %c0_i32 = arith.constant 0 : i32
    %c0_i32_0 = arith.constant 0 : i32
    %c0_i32_1 = arith.constant 0 : i32
    return %c0_i32, %c0_i32_0 : i32, i32
  }
  func.func @transform_2(%arg0: i32) -> (i32, i32) {
    %c0_i32 = arith.constant 0 : i32
    %c0_i32_0 = arith.constant 0 : i32
    %c0_i32_1 = arith.constant 0 : i32
    return %c0_i32, %c0_i32_0 : i32, i32
  }
  func.func @transform_3(%arg0: i32) -> (i32, i32) {
    %c0_i32 = arith.constant 0 : i32
    %c0_i32_0 = arith.constant 0 : i32
    %c0_i32_1 = arith.constant 0 : i32
    return %c0_i32, %c0_i32_0 : i32, i32
  }
  func.func @transform_4(%arg0: i32) -> (i32, i32) {
    %c0_i32 = arith.constant 0 : i32
    %c0_i32_0 = arith.constant 0 : i32
    %c0_i32_1 = arith.constant 0 : i32
    return %c0_i32, %c0_i32_0 : i32, i32
  }
  func.func @transform_5(%arg0: i32) -> (i32, i32) {
    %c0_i32 = arith.constant 0 : i32
    %c0_i32_0 = arith.constant 0 : i32
    return %c0_i32, %arg0 : i32, i32
  }
}

</mosaic_0001>

<bundles_post_ra>
// kernel: nn_policy_forward.1
= control target key start
LH: loop header
LB: loop body
LE: loop exit
PB: predicated region body
PF: predicated region fallthrough
CT: control target
= control target key end

     0   :  { %v772_v0 = vmov 1   ;;  %v773_v1 = vmov 0   ;;  %v774_v6 = vmov 2   ;;  %v775_v11 = vmov 3   ;;  %s1207_s1 = inlined_call_operand.vmem [shape: f32[128,4], index: 1, kind: input, shape index: {}]   ;;  %s1208_s2 = inlined_call_operand.vmem [shape: f32[128,1], index: 2, kind: input, shape index: {}]   ;;  %s1209_s0 = inlined_call_operand.vmem [shape: f32[4,128], index: 0, kind: input, shape index: {}]   ;;  %s1210_s4 = inlined_call_operand.vmem [shape: f32[2,1], index: 4, kind: input, shape index: {}]   ;;  %s1211_s3 = inlined_call_operand.vmem [shape: f32[2,128], index: 3, kind: input, shape index: {}]   ;;  %s1212_s5 = inlined_call_operand.vmem [shape: f32[2,128], index: 5, kind: output, shape index: {}]  }
   0x1   :  { %716 = vset.pattern.permute.xlu0 %v772_v0  ;;  %717 = vset.pattern.permute.xlu1 %v773_v1  ;;  %v813_v2 = vld [vmem:[%s1207_s1 + $0x78] sm:$0xff]  ;;  %v35_v3 = vld [vmem:[%s1207_s1 + $0x70] sm:$0xff]  ;;  %v829_v5 = vld [vmem:[%s1207_s1 + $0x40] sm:$0xff]  ;;  %v776_v23 = vmov 0.0   ;;  %v117_v42 = vlaneseq  ;;  %vm777_vm0 = vmmov 0  }
   0x2   :  { %198 = vperm.xlu0 %716, %v813_v2   ;;  %109 = vperm.xlu1 %717, %v35_v3   ;;  %v822_v4 = vld [vmem:[%s1207_s1 + $0x58] sm:$0xff]  ;;  %v836_v7 = vld [vmem:[%s1207_s1 + $0x28] sm:$0xff]  ;;  %v846_v9 = vld [vmem:[%s1207_s1 + $0x10] sm:$0xff] }
   0x3   :  { %v34_v8 = vld [vmem:[%s1207_s1 + $0x68] sm:$0xff]  ;;  %v33_v10 = vld [vmem:[%s1207_s1 + $0x60] sm:$0xff]  ;;  %v452_v12 = vld [vmem:[%s1208_s2 + $0x78] sm:$0xff]  ;;  %675 = vmatprep.subr.mxu0 %v776_v23  ;;  %v118_v46 = vshrl.u32 %v117_v42, 7  ;;  %707 = vmatprep.mubr.msk.f32.mxu0 %vm777_vm0, %v776_v23 }
   0x4   :  { %v30_v13 = vld [vmem:[%s1207_s1 + $0x48] sm:$0xff]  ;;  %v31_v14 = vld [vmem:[%s1207_s1 + $0x50] sm:$0xff]  ;;  %v449_v15 = vld [vmem:[%s1208_s2 + $0x60] sm:$0xff] }
   0x5   :  { %v885_v16 = vld [vmem:[%s1207_s1 + $0x30] sm:$0xff]  ;;  %v446_v17 = vld [vmem:[%s1208_s2 + $0x48] sm:$0xff]  ;;  %v898_v19 = vld [vmem:[%s1207_s1 + $0x18] sm:$0xff]  ;;  %v203_v47 = vsub.s32 1, %v118_v46  ;;  %v119_v49 = vsub.s32 0, %v118_v46  ;;  %v303_v50 = vsub.s32 2, %v118_v46 }
   0x6   :  { %718 = vset.pattern.permute.xlu1 %v772_v0  ;;  %182 = vperm.xlu0 %716, %v822_v4   ;;  %v451_v18 = vld [vmem:[%s1208_s2 + $0x70] sm:$0xff]  ;;  %v909_v21 = vld [vmem:[%s1207_s1] sm:$0xff]  ;;  %v450_v22 = vld [vmem:[%s1208_s2 + $0x68] sm:$0xff] }
   0x7   :  { %194 = vperm.xlu1 %718, %v35_v3   ;;  %v443_v20 = vld [vmem:[%s1208_s2 + $0x30] sm:$0xff]  ;;  %v28_v24 = vld [vmem:[%s1207_s1 + $0x38] sm:$0xff]  ;;  %v933_v25 = vld [vmem:[%s1207_s1 + $0x8] sm:$0xff] }
   0x8   :  { %v438_v26 = vld [vmem:[%s1208_s2 + $0x8] sm:$0xff]  ;;  %v448_v27 = vld [vmem:[%s1208_s2 + $0x58] sm:$0xff]  ;;  %v447_v33 = vld [vmem:[%s1208_s2 + $0x50] sm:$0xff] }
   0x9   :  { %v25_v43 = vld [vmem:[%s1207_s1 + $0x20] sm:$0xff] }
   0xa   :  { %170 = vperm.xlu0 %716, %v829_v5   ;;  %v20_v52 = vld [vmem:[%s1209_s0] sm:$0xf] }
   0xb   :  { %719 = vset.pattern.permute.xlu1 %v774_v6  ;;  %v997_v53 = vrot.slane %v20_v52, %v203_v47  ;;  %v1001_v55 = vrot.slane %v20_v52, %v119_v49  ;;  %v1004_v57 = vrot.slane %v20_v52, %v303_v50  ;;  %v445_v62 = vld [vmem:[%s1208_s2 + $0x40] sm:$0xff] }
   0xc   :  { %298 = vperm.xlu1 %719, %v813_v2  }
   0xe   :  { %158 = vperm.xlu0 %716, %v836_v7  }
  0x10   :  { %720 = vset.pattern.permute.xlu1 %v772_v0 }
  0x11   :  { %190 = vperm.xlu1 %720, %v34_v8  }
  0x12   :  { %146 = vperm.xlu0 %716, %v846_v9  }
  0x15   :  { %721 = vset.pattern.permute.xlu1 %v774_v6 }
  0x16   :  { %294 = vperm.xlu1 %721, %v35_v3   ;;  %753 = vset.pattern.permute.xlu0 %v774_v6 }
  0x17   :  { %290 = vperm.xlu0 %753, %v34_v8  }
  0x1a   :  { %722 = vset.pattern.permute.xlu1 %v773_v1 }
  0x1b   :  { %99 = vperm.xlu1 %722, %v33_v10   ;;  %282 = vperm.xlu0 %753, %v822_v4  }
  0x1f   :  { %723 = vset.pattern.permute.xlu1 %v772_v0  ;;  %270 = vperm.xlu0 %753, %v829_v5  }
  0x20   :  { %186 = vperm.xlu1 %723, %v33_v10  }
  0x23   :  { %258 = vperm.xlu0 %753, %v836_v7  }
  0x24   :  { %724 = vset.pattern.permute.xlu1 %v775_v11 }
  0x25   :  { %394 = vperm.xlu1 %724, %v35_v3  }
  0x27   :  { %246 = vperm.xlu0 %753, %v846_v9  }
  0x29   :  { %725 = vset.pattern.permute.xlu1 %v773_v1 }
  0x2a   :  { %94 = vperm.xlu1 %725, %v822_v4  }
  0x2b   :  { %758 = vset.pattern.permute.xlu0 %v773_v1 }
  0x2c   :  { %114 = vperm.xlu0 %758, %v813_v2  }
  0x2e   :  { %726 = vset.pattern.permute.xlu1 %v774_v6 }
  0x2f   :  { %286 = vperm.xlu1 %726, %v33_v10  }
  0x30   :  { %104 = vperm.xlu0 %758, %v34_v8  }
  0x33   :  { %727 = vset.pattern.permute.xlu1 %v775_v11 }
  0x34   :  { %390 = vperm.xlu1 %727, %v34_v8   ;;  %530 = vperm.xlu0 %758, %v452_v12   ;;  %v444_v12 = vld [vmem:[%s1208_s2 + $0x38] sm:$0xff] }
  0x38   :  { %728 = vset.pattern.permute.xlu1 %v773_v1  ;;  %84 = vperm.xlu0 %758, %v30_v13  }
  0x39   :  { %89 = vperm.xlu1 %728, %v31_v14  }
  0x3c   :  { %515 = vperm.xlu0 %758, %v449_v15  }
  0x3d   :  { %729 = vset.pattern.permute.xlu1 %v772_v0 }
  0x3e   :  { %178 = vperm.xlu1 %729, %v31_v14  }
  0x40   :  { %69 = vperm.xlu0 %758, %v885_v16  }
  0x42   :  { %730 = vset.pattern.permute.xlu1 %v775_v11 }
  0x43   :  { %386 = vperm.xlu1 %730, %v33_v10  }
  0x44   :  { %500 = vperm.xlu0 %758, %v446_v17  }
  0x47   :  { %731 = vset.pattern.permute.xlu1 %v773_v1 }
  0x48   :  { %525 = vperm.xlu1 %731, %v451_v18   ;;  %54 = vperm.xlu0 %758, %v898_v19  }
  0x4c   :  { %732 = vset.pattern.permute.xlu1 %v772_v0  ;;  %485 = vperm.xlu0 %758, %v443_v20  }
  0x4d   :  { %174 = vperm.xlu1 %732, %v30_v13  }
  0x50   :  { %39 = vperm.xlu0 %758, %v909_v21  }
  0x51   :  { %733 = vset.pattern.permute.xlu1 %v774_v6 }
  0x52   :  { %278 = vperm.xlu1 %733, %v31_v14  }
  0x54   :  { %761 = vset.pattern.permute.xlu0 %v775_v11 }
  0x55   :  { %398 = vperm.xlu0 %761, %v813_v2  }
  0x56   :  { %734 = vset.pattern.permute.xlu1 %v773_v1 }
  0x57   :  { %520 = vperm.xlu1 %734, %v450_v22   ;;  %v403_v22 = vsub.s32 3, %v118_v46 }
  0x59   :  { %382 = vperm.xlu0 %761, %v822_v4   ;;  %v1055_v42 = vrot.slane %v20_v52, %v403_v22 }
  0x5b   :  { %79 = vperm.xlu1 %734, %v829_v5  }
  0x5d   :  { %370 = vperm.xlu0 %761, %v829_v5  }
  0x5f   :  { %735 = vset.pattern.permute.xlu1 %v774_v6 }
  0x60   :  { %274 = vperm.xlu1 %735, %v30_v13  }
  0x61   :  { %358 = vperm.xlu0 %761, %v836_v7  }
  0x64   :  { %736 = vset.pattern.permute.xlu1 %v775_v11 }
  0x65   :  { %378 = vperm.xlu1 %736, %v31_v14   ;;  %346 = vperm.xlu0 %761, %v846_v9  }
  0x69   :  { %737 = vset.pattern.permute.xlu1 %v773_v1  ;;  %342 = vperm.xlu0 %761, %v933_v25  }
  0x6a   :  { %74 = vperm.xlu1 %737, %v28_v24  }
  0x6d   :  { %338 = vperm.xlu0 %761, %v909_v21  }
  0x6e   :  { %738 = vset.pattern.permute.xlu1 %v772_v0 }
  0x6f   :  { %166 = vperm.xlu1 %738, %v28_v24  }
  0x71   :  { %767 = vset.pattern.permute.xlu0 %v773_v1 }
  0x72   :  { %460 = vperm.xlu0 %767, %v438_v26  }
  0x73   :  { %739 = vset.pattern.permute.xlu1 %v775_v11 }
  0x74   :  { %374 = vperm.xlu1 %739, %v30_v13  }
  0x78   :  { %740 = vset.pattern.permute.xlu1 %v773_v1 }
  0x79   :  { %510 = vperm.xlu1 %740, %v448_v27  }
  0x7d   :  { %v948_v28 = vpop.permute.xlu1 %109  ;;  %741 = vset.pattern.permute.xlu1 %v772_v0  ;;  %v951_v29 = vpop.permute.xlu0 %198 }
  0x7e   :  { %162 = vperm.xlu1 %741, %v885_v16   ;;  %v220_v26 = vmul.f32 %v997_v53, %v951_v29  ;;  %v135_v29 = vmul.f32 %v1001_v55, %v948_v28 }
  0x81   :  { %v183_v30 = vpop.permute.xlu0 %182 }
  0x82   :  { %v954_v31 = vpop.permute.xlu1 %194  ;;  %742 = vset.pattern.permute.xlu1 %v774_v6  ;;  %v216_v56 = vmul.f32 %v997_v53, %v183_v30 }
  0x83   :  { %266 = vperm.xlu1 %742, %v28_v24  }
  0x85   :  { %v957_v32 = vpop.permute.xlu0 %170 }
  0x87   :  { %v962_v34 = vpop.permute.xlu1 %298  ;;  %743 = vset.pattern.permute.xlu1 %v773_v1 }
  0x88   :  { %505 = vperm.xlu1 %743, %v447_v33   ;;  %v219_v33 = vmul.f32 %v997_v53, %v954_v31 }
  0x89   :  { %v965_v35 = vpop.permute.xlu0 %158 }
  0x8a   :  { %v235_v52 = vadd.f32 %v219_v33, %v135_v29 }
  0x8c   :  { %v967_v36 = vpop.permute.xlu1 %190  ;;  %64 = vperm.xlu1 %743, %v836_v7  }
  0x8d   :  { %v970_v37 = vpop.permute.xlu0 %146 }
  0x90   :  { %744 = vset.pattern.permute.xlu1 %v774_v6 }
  0x91   :  { %v973_v38 = vpop.permute.xlu1 %294  ;;  %262 = vperm.xlu1 %744, %v885_v16  }
  0x92   :  { %v976_v39 = vpop.permute.xlu0 %290  ;;  %v319_v46 = vmul.f32 %v1004_v57, %v973_v38 }
  0x93   :  { %v318_v31 = vmul.f32 %v1004_v57, %v976_v39 }
  0x95   :  { %745 = vset.pattern.permute.xlu1 %v775_v11 }
  0x96   :  { %v979_v40 = vpop.permute.xlu1 %99  ;;  %366 = vperm.xlu1 %745, %v28_v24   ;;  %v283_v41 = vpop.permute.xlu0 %282 }
  0x97   :  { %v316_v59 = vmul.f32 %v1004_v57, %v283_v41  ;;  %v218_v41 = vmul.f32 %v997_v53, %v967_v36  ;;  %v133_v28 = vmul.f32 %v1001_v55, %v979_v40 }
  0x9a   :  { %746 = vset.pattern.permute.xlu1 %v773_v1  ;;  %v985_v44 = vpop.permute.xlu0 %270 }
  0x9b   :  { %v987_v45 = vpop.permute.xlu1 %186  ;;  %59 = vperm.xlu1 %746, %v25_v43  }
  0x9c   :  { %v217_v47 = vmul.f32 %v997_v53, %v987_v45 }
  0x9e   :  { %v989_v48 = vpop.permute.xlu0 %258 }
  0x9f   :  { %747 = vset.pattern.permute.xlu1 %v772_v0 }
  0xa0   :  { %v992_v51 = vpop.permute.xlu1 %394  ;;  %154 = vperm.xlu1 %747, %v25_v43  }
  0xa1   :  { %v419_v38 = vmul.f32 %v1055_v42, %v992_v51 }
  0xa2   :  { %v999_v54 = vpop.permute.xlu0 %246 }
  0xa4   :  { %748 = vset.pattern.permute.xlu1 %v775_v11 }
  0xa5   :  { %v95_v58 = vpop.permute.xlu1 %94  ;;  %362 = vperm.xlu1 %748, %v885_v16  }
  0xa6   :  { %v132_v60 = vmul.f32 %v1001_v55, %v95_v58  ;;  %v335_v58 = vadd.f32 %v319_v46, %v235_v52 }
  0xa7   :  { %v115_v61 = vpop.permute.xlu0 %114 }
  0xa8   :  { %v232_v63 = vadd.f32 %v216_v56, %v132_v60  ;;  %v320_v56 = vmul.f32 %v1004_v57, %v962_v34  ;;  %v435_v51 = vadd.f32 %v419_v38, %v335_v58 }
  0xa9   :  { %749 = vset.pattern.permute.xlu1 %v773_v1 }
  0xaa   :  { %v287_v2 = vpop.permute.xlu1 %286  ;;  %495 = vperm.xlu1 %749, %v445_v62   ;;  %v1014_v3 = vadd.f32 %v316_v59, %v232_v63  ;;  %v233_v59 = vadd.f32 %v217_v47, %v133_v28 }
  0xab   :  { %v105_v4 = vpop.permute.xlu0 %104  ;;  %v317_v45 = vmul.f32 %v1004_v57, %v287_v2  ;;  %v213_v2 = vmul.f32 %v997_v53, %v957_v32  ;;  %v442_v32 = vld [vmem:[%s1208_s2 + $0x28] sm:$0xff] }
  0xac   :  { %v134_v30 = vmul.f32 %v1001_v55, %v105_v4 }
  0xad   :  { %v333_v4 = vadd.f32 %v317_v45, %v233_v59 }
  0xae   :  { %750 = vset.pattern.permute.xlu1 %v772_v0  ;;  %v234_v36 = vadd.f32 %v218_v41, %v134_v30  ;;  %v313_v30 = vmul.f32 %v1004_v57, %v985_v44 }
  0xaf   :  { %v391_v5 = vpop.permute.xlu1 %390  ;;  %150 = vperm.xlu1 %750, %v898_v19   ;;  %v1018_v7 = vpop.permute.xlu0 %530 }
  0xb0   :  { %v334_v40 = vadd.f32 %v318_v31, %v234_v36  ;;  %v441_v31 = vld [vmem:[%s1208_s2 + $0x20] sm:$0xff] }
  0xb3   :  { %751 = vset.pattern.permute.xlu1 %v774_v6  ;;  %v1021_v8 = vpop.permute.xlu0 %84 }
  0xb4   :  { %v1023_v10 = vpop.permute.xlu1 %89  ;;  %254 = vperm.xlu1 %751, %v25_v43  }
  0xb7   :  { %v1028_v13 = vpop.permute.xlu0 %515 }
  0xb8   :  { %752 = vset.pattern.permute.xlu1 %v773_v1 }
  0xb9   :  { %v1031_v14 = vpop.permute.xlu1 %178  ;;  %490 = vperm.xlu1 %752, %v444_v12  }
  0xbb   :  { %v1033_v15 = vpop.permute.xlu0 %69 }
  0xbd   :  { %49 = vperm.xlu1 %752, %v846_v9   ;;  %v136_v9 = vmul.f32 %v1001_v55, %v115_v61  ;;  %v418_v61 = vmul.f32 %v1055_v42, %v391_v5 }
  0xbe   :  { %v387_v16 = vpop.permute.xlu1 %386 }
  0xbf   :  { %v1036_v17 = vpop.permute.xlu0 %500  ;;  %v236_v49 = vadd.f32 %v220_v26, %v136_v9  ;;  %v417_v62 = vmul.f32 %v1055_v42, %v387_v16  ;;  %v434_v9 = vadd.f32 %v418_v61, %v334_v40 }
  0xc1   :  { %754 = vset.pattern.permute.xlu1 %v774_v6  ;;  %v336_v60 = vadd.f32 %v320_v56, %v236_v49  ;;  %v433_v22 = vadd.f32 %v417_v62, %v333_v4 }
  0xc2   :  { %250 = vperm.xlu1 %754, %v898_v19  }
  0xc3   :  { %v526_v18 = vpop.permute.xlu1 %525  ;;  %v1040_v20 = vpop.permute.xlu0 %54 }
  0xc4   :  { %v547_v26 = vadd.f32 %v526_v18, %v435_v51  ;;  %v437_v51 = vld [vmem:[%s1208_s2] sm:$0xff] }
  0xc6   :  { %755 = vset.pattern.permute.xlu1 %v775_v11  ;;  %v563_v18 = vmax.f32 %v547_v26, 0.0 }
  0xc7   :  { %354 = vperm.xlu1 %755, %v25_v43   ;;  %v1043_v24 = vpop.permute.xlu0 %485 }
  0xc8   :  { %v1048_v27 = vpop.permute.xlu1 %174 }
  0xc9   :  { %v214_v36 = vmul.f32 %v997_v53, %v1048_v27 }
  0xcb   :  { %756 = vset.pattern.permute.xlu1 %v773_v1  ;;  %v1058_v43 = vpop.permute.xlu0 %39 }
  0xcc   :  { %44 = vperm.xlu1 %756, %v933_v25  }
  0xcd   :  { %v1069_v50 = vpop.permute.xlu1 %278 }
  0xd0   :  { %757 = vset.pattern.permute.xlu1 %v772_v0  ;;  %v399_v39 = vpop.permute.xlu0 %398 }
  0xd1   :  { %v420_v34 = vmul.f32 %v1055_v42, %v399_v39  ;;  %142 = vperm.xlu1 %757, %v933_v25  }
  0xd2   :  { %v521_v63 = vpop.permute.xlu1 %520 }
  0xd3   :  { %v436_v12 = vadd.f32 %v420_v34, %v336_v60  ;;  %v546_v33 = vadd.f32 %v521_v63, %v434_v9  ;;  %v440_v60 = vld [vmem:[%s1208_s2 + $0x18] sm:$0xff] }
  0xd4   :  { %v383_v38 = vpop.permute.xlu0 %382 }
  0xd5   :  { %759 = vset.pattern.permute.xlu1 %v775_v11  ;;  %v548_v5 = vadd.f32 %v1018_v7, %v436_v12  ;;  %v545_v11 = vadd.f32 %v1028_v13, %v433_v22  ;;  %v416_v59 = vmul.f32 %v1055_v42, %v383_v38  ;;  %v566_v12 = vld [vmem:[%s1210_s4] sm:$0x3] }
  0xd6   :  { %v80_v16 = vpop.permute.xlu1 %79  ;;  %350 = vperm.xlu1 %759, %v898_v19   ;;  %v562_v19 = vmax.f32 %v546_v33, 0.0  ;;  %v310_v33 = vmul.f32 %v1004_v57, %v989_v48 }
  0xd7   :  { %v129_v41 = vmul.f32 %v1001_v55, %v80_v16  ;;  %v564_v29 = vmax.f32 %v548_v5, 0.0  ;;  %v561_v47 = vmax.f32 %v545_v11, 0.0  ;;  %v432_v62 = vadd.f32 %v416_v59, %v1014_v3 }
  0xd8   :  { %v131_v3 = vmul.f32 %v1001_v55, %v1023_v10  ;;  %v371_v48 = vpop.permute.xlu0 %370 }
  0xd9   :  { %v229_v46 = vadd.f32 %v213_v2, %v129_v41  ;;  %676 = vmatpush3.msra.mxu0 %v564_v29 }
  0xda   :  { %760 = vset.pattern.permute.xlu1 %v773_v1  ;;  %677 = vmatprep.subr.mxu0 %v776_v23 }
  0xdb   :  { %v275_v7 = vpop.permute.xlu1 %274  ;;  %480 = vperm.xlu1 %760, %v442_v32   ;;  %678 = vmatpush3.msra.mxu0 %v563_v18  ;;  %v1097_v44 = vadd.f32 %v313_v30, %v229_v46 }
  0xdc   :  { %679 = vmatprep.subr.mxu0 %v776_v23 }
  0xdd   :  { %680 = vmatpush3.msra.mxu0 %v562_v19 }
  0xde   :  { %681 = vmatprep.subr.mxu0 %v776_v23 }
  0xdf   :  { %762 = vset.pattern.permute.xlu1 %v772_v0  ;;  %682 = vmatpush3.msra.mxu0 %v561_v47  ;;  %v130_v0 = vmul.f32 %v1001_v55, %v1021_v8 }
  0xe0   :  { %v379_v13 = vpop.permute.xlu1 %378  ;;  %138 = vperm.xlu1 %762, %v909_v21   ;;  %683 = vmatprep.subr.mxu0 %v776_v23 }
  0xe1   :  { %v230_v58 = vadd.f32 %v214_v36, %v130_v0  ;;  %v415_v22 = vmul.f32 %v1055_v42, %v379_v13 }
  0xe4   :  { %763 = vset.pattern.permute.xlu1 %v774_v6 }
  0xe5   :  { %v75_v49 = vpop.permute.xlu1 %74  ;;  %242 = vperm.xlu1 %763, %v933_v25   ;;  %v314_v25 = vmul.f32 %v1004_v57, %v275_v7 }
  0xe6   :  { %v128_v56 = vmul.f32 %v1001_v55, %v75_v49  ;;  %v413_v49 = vmul.f32 %v1055_v42, %v371_v48 }
  0xe7   :  { %v330_v27 = vadd.f32 %v314_v25, %v230_v58 }
  0xe8   :  { %v429_v0 = vadd.f32 %v413_v49, %v1097_v44 }
  0xe9   :  { %764 = vset.pattern.permute.xlu1 %v773_v1 }
  0xea   :  { %v167_v52 = vpop.permute.xlu1 %166  ;;  %475 = vperm.xlu1 %764, %v441_v31  }
  0xeb   :  { %v212_v28 = vmul.f32 %v997_v53, %v167_v52 }
  0xed   :  { %v1117_v45 = vadd.f32 %v212_v28, %v128_v56  ;;  %v127_v28 = vmul.f32 %v1001_v55, %v1033_v15 }
  0xee   :  { %765 = vset.pattern.permute.xlu1 %v774_v6 }
  0xef   :  { %v375_v8 = vpop.permute.xlu1 %374  ;;  %238 = vperm.xlu1 %765, %v909_v21   ;;  %v439_v21 = vld [vmem:[%s1208_s2 + $0x10] sm:$0xff] }
  0xf0   :  { %v414_v39 = vmul.f32 %v1055_v42, %v375_v8 }
  0xf2   :  { %v430_v61 = vadd.f32 %v414_v39, %v330_v27 }
  0xf3   :  { %766 = vset.pattern.permute.xlu1 %v773_v1  ;;  %v215_v1 = vmul.f32 %v997_v53, %v1031_v14 }
  0xf4   :  { %v511_v34 = vpop.permute.xlu1 %510  ;;  %470 = vperm.xlu1 %766, %v440_v60   ;;  %v542_v6 = vadd.f32 %v1036_v17, %v430_v61  ;;  %v315_v17 = vmul.f32 %v1004_v57, %v1069_v50  ;;  %v210_v50 = vmul.f32 %v997_v53, %v965_v35 }
  0xf5   :  { %v544_v40 = vadd.f32 %v511_v34, %v432_v62  ;;  %v231_v2 = vadd.f32 %v215_v1, %v131_v3 }
  0xf6   :  { %v558_v29 = vmax.f32 %v542_v6, 0.0 }
  0xf7   :  { %v560_v63 = vmax.f32 %v544_v40, 0.0  ;;  %v331_v26 = vadd.f32 %v315_v17, %v231_v2 }
  0xf8   :  { %465 = vperm.xlu1 %766, %v439_v21  }
  0xf9   :  { %v163_v4 = vpop.permute.xlu1 %162  ;;  %684 = vmatpush3.msra.mxu0 %v560_v63  ;;  %v431_v9 = vadd.f32 %v415_v22, %v331_v26 }
  0xfa   :  { %685 = vmatprep.subr.mxu0 %v776_v23  ;;  %v211_v38 = vmul.f32 %v997_v53, %v163_v4  ;;  %v207_v4 = vmul.f32 %v997_v53, %v970_v37 }
  0xfc   :  { %455 = vperm.xlu1 %766, %v437_v51   ;;  %v227_v59 = vadd.f32 %v211_v38, %v127_v28  ;;  %v121_v38 = vmul.f32 %v1001_v55, %v1058_v43 }
  0xfe   :  { %v267_v14 = vpop.permute.xlu1 %266 }
  0xff   :  { %v312_v8 = vmul.f32 %v1004_v57, %v267_v14  ;;  %v359_v14 = vpop.permute.xlu0 %358 }
 0x100   :  { %569 = vperm.xlu1 %766, %v566_v12   ;;  %v410_v37 = vmul.f32 %v1055_v42, %v359_v14 }
 0x101   :  { %v328_v61 = vadd.f32 %v312_v8, %v1117_v45  ;;  %v307_v45 = vmul.f32 %v1004_v57, %v999_v54 }
 0x103   :  { %v506_v5 = vpop.permute.xlu1 %505 }
 0x104   :  { %v543_v10 = vadd.f32 %v506_v5, %v431_v9 }
 0x106   :  { %v559_v16 = vmax.f32 %v543_v10, 0.0 }
 0x107   :  { %v65_v30 = vpop.permute.xlu1 %64 }
 0x108   :  { %v126_v41 = vmul.f32 %v1001_v55, %v65_v30  ;;  %686 = vmatpush3.msra.mxu0 %v559_v16 }
 0x109   :  { %687 = vmatprep.subr.mxu0 %v776_v23 }
 0x10a   :  { %v226_v32 = vadd.f32 %v210_v50, %v126_v41  ;;  %688 = vmatpush3.msra.mxu0 %v558_v29  ;;  %v347_v29 = vpop.permute.xlu0 %346 }
 0x10b   :  { %689 = vmatprep.subr.mxu0 %v776_v23 }
 0x10c   :  { %v263_v18 = vpop.permute.xlu1 %262  ;;  %v326_v46 = vadd.f32 %v310_v33, %v226_v32 }
 0x10d   :  { %v311_v58 = vmul.f32 %v1004_v57, %v263_v18 }
 0x10e   :  { %v426_v9 = vadd.f32 %v410_v37, %v326_v46 }
 0x10f   :  { %v327_v44 = vadd.f32 %v311_v58, %v227_v59  ;;  %v407_v58 = vmul.f32 %v1055_v42, %v347_v29 }
 0x111   :  { %v367_v11 = vpop.permute.xlu1 %366 }
 0x112   :  { %v412_v39 = vmul.f32 %v1055_v42, %v367_v11  ;;  %v124_v11 = vmul.f32 %v1001_v55, %v1040_v20 }
 0x114   :  { %v428_v62 = vadd.f32 %v412_v39, %v328_v61 }
 0x116   :  { %v60_v19 = vpop.permute.xlu1 %59 }
 0x117   :  { %v125_v35 = vmul.f32 %v1001_v55, %v60_v19 }
 0x11b   :  { %v155_v7 = vpop.permute.xlu1 %154 }
 0x11c   :  { %v209_v47 = vmul.f32 %v997_v53, %v155_v7 }
 0x11e   :  { %v225_v13 = vadd.f32 %v209_v47, %v125_v35  ;;  %v343_v35 = vpop.permute.xlu0 %342 }
 0x11f   :  { %v406_v59 = vmul.f32 %v1055_v42, %v343_v35 }
 0x120   :  { %v363_v31 = vpop.permute.xlu1 %362 }
 0x121   :  { %v411_v27 = vmul.f32 %v1055_v42, %v363_v31 }
 0x123   :  { %v427_v15 = vadd.f32 %v411_v27, %v327_v44 }
 0x125   :  { %v496_v36 = vpop.permute.xlu1 %495  ;;  %v539_v40 = vadd.f32 %v1043_v24, %v427_v15 }
 0x126   :  { %v541_v52 = vadd.f32 %v496_v36, %v429_v0 }
 0x127   :  { %v555_v1 = vmax.f32 %v539_v40, 0.0 }
 0x128   :  { %v557_v56 = vmax.f32 %v541_v52, 0.0 }
 0x12a   :  { %v151_v25 = vpop.permute.xlu1 %150  ;;  %690 = vmatpush3.msra.mxu0 %v557_v56 }
 0x12b   :  { %691 = vmatprep.subr.mxu0 %v776_v23  ;;  %v208_v46 = vmul.f32 %v997_v53, %v151_v25  ;;  %v339_v25 = vpop.permute.xlu0 %338 }
 0x12c   :  { %v405_v40 = vmul.f32 %v1055_v42, %v339_v25 }
 0x12f   :  { %v255_v60 = vpop.permute.xlu1 %254  ;;  %v461_v15 = vpop.permute.xlu0 %460 }
 0x130   :  { %v309_v54 = vmul.f32 %v1004_v57, %v255_v60 }
 0x132   :  { %v325_v41 = vadd.f32 %v309_v54, %v225_v13  ;;  %v224_v13 = vadd.f32 %v208_v46, %v124_v11 }
 0x134   :  { %v491_v34 = vpop.permute.xlu1 %490 }
 0x135   :  { %v540_v6 = vadd.f32 %v491_v34, %v428_v62 }
 0x137   :  { %v556_v21 = vmax.f32 %v540_v6, 0.0 }
 0x138   :  { %v50_v63 = vpop.permute.xlu1 %49 }
 0x139   :  { %v123_v51 = vmul.f32 %v1001_v55, %v50_v63  ;;  %692 = vmatpush3.msra.mxu0 %v556_v21 }
 0x13a   :  { %693 = vmatprep.subr.mxu0 %v776_v23 }
 0x13b   :  { %v223_v3 = vadd.f32 %v207_v4, %v123_v51  ;;  %694 = vmatpush3.msra.mxu0 %v555_v1 }
 0x13c   :  { %695 = vmatprep.subr.mxu0 %v776_v23 }
 0x13d   :  { %v251_v17 = vpop.permute.xlu1 %250  ;;  %v323_v24 = vadd.f32 %v307_v45, %v223_v3  ;;  %v565_v45 = vld [vmem:[%s1211_s3] sm:$0x3] }
 0x13e   :  { %v308_v47 = vmul.f32 %v1004_v57, %v251_v17 }
 0x140   :  { %v324_v20 = vadd.f32 %v308_v47, %v224_v13 }
 0x142   :  { %v355_v12 = vpop.permute.xlu1 %354 }
 0x143   :  { %v409_v50 = vmul.f32 %v1055_v42, %v355_v12 }
 0x145   :  { %v425_v32 = vadd.f32 %v409_v50, %v325_v41 }
 0x147   :  { %v45_v2 = vpop.permute.xlu1 %44 }
 0x148   :  { %v122_v48 = vmul.f32 %v1001_v55, %v45_v2 }
 0x14c   :  { %v143_v22 = vpop.permute.xlu1 %142 }
 0x14d   :  { %v206_v19 = vmul.f32 %v997_v53, %v143_v22 }
 0x14f   :  { %v222_v0 = vadd.f32 %v206_v19, %v122_v48 }
 0x151   :  { %v351_v26 = vpop.permute.xlu1 %350 }
 0x152   :  { %v408_v36 = vmul.f32 %v1055_v42, %v351_v26 }
 0x154   :  { %v424_v27 = vadd.f32 %v408_v36, %v324_v20 }
 0x156   :  { %v481_v5 = vpop.permute.xlu1 %480 }
 0x157   :  { %v538_v10 = vadd.f32 %v481_v5, %v426_v9 }
 0x159   :  { %v554_v16 = vmax.f32 %v538_v10, 0.0 }
 0x15b   :  { %v139_v30 = vpop.permute.xlu1 %138  ;;  %696 = vmatpush3.msra.mxu0 %v554_v16 }
 0x15c   :  { %697 = vmatprep.subr.mxu0 %v776_v23  ;;  %v205_v56 = vmul.f32 %v997_v53, %v139_v30  ;;  %v423_v53 = vadd.f32 %v407_v58, %v323_v24 }
 0x15e   :  { %v221_v39 = vadd.f32 %v205_v56, %v121_v38 }
 0x160   :  { %v243_v33 = vpop.permute.xlu1 %242 }
 0x161   :  { %v306_v49 = vmul.f32 %v1004_v57, %v243_v33 }
 0x163   :  { %v322_v28 = vadd.f32 %v306_v49, %v222_v0 }
 0x165   :  { %v476_v18 = vpop.permute.xlu1 %475  ;;  %v422_v60 = vadd.f32 %v406_v59, %v322_v28 }
 0x166   :  { %v537_v7 = vadd.f32 %v476_v18, %v425_v32 }
 0x167   :  { %v534_v55 = vadd.f32 %v461_v15, %v422_v60 }
 0x168   :  { %v553_v31 = vmax.f32 %v537_v7, 0.0 }
 0x169   :  { %v550_v4 = vmax.f32 %v534_v55, 0.0 }
 0x16a   :  { %v239_v52 = vpop.permute.xlu1 %238  ;;  %698 = vmatpush3.msra.mxu0 %v553_v31 }
 0x16b   :  { %699 = vmatprep.subr.mxu0 %v776_v23  ;;  %v305_v8 = vmul.f32 %v1004_v57, %v239_v52 }
 0x16d   :  { %v321_v62 = vadd.f32 %v305_v8, %v221_v39 }
 0x16f   :  { %v471_v44 = vpop.permute.xlu1 %470  ;;  %v421_v63 = vadd.f32 %v405_v40, %v321_v62 }
 0x170   :  { %v536_v61 = vadd.f32 %v471_v44, %v424_v27 }
 0x172   :  { %v552_v34 = vmax.f32 %v536_v61, 0.0 }
 0x173   :  { %v466_v6 = vpop.permute.xlu1 %465 }
 0x174   :  { %v535_v43 = vadd.f32 %v466_v6, %v423_v53  ;;  %700 = vmatpush3.msra.mxu0 %v552_v34 }
 0x175   :  { %701 = vmatprep.subr.mxu0 %v776_v23 }
 0x176   :  { %v551_v21 = vmax.f32 %v535_v43, 0.0 }
 0x177   :  { %v456_v57 = vpop.permute.xlu1 %455 }
 0x178   :  { %v533_v51 = vadd.f32 %v456_v57, %v421_v63  ;;  %702 = vmatpush3.msra.mxu0 %v551_v21 }
 0x179   :  { %703 = vmatprep.subr.mxu0 %v776_v23 }
 0x17a   :  { %v549_v1 = vmax.f32 %v533_v51, 0.0  ;;  %704 = vmatpush3.msra.mxu0 %v550_v4 }
 0x17b   :  { %705 = vmatprep.subr.mxu0 %v776_v23  ;;  %v570_v42 = vpop.permute.xlu1 %569 }
 0x17c   :  { %706 = vmatpush3.msra.mxu0 %v549_v1 }
 0x17d   :  { %708 = vmatmul.mubr.f32.vlgmr.msra.gmra.mxu0 %v565_v45 }
 0x23d   :  { %v638_v3 = vpop.f32.mrf.mxu0 }
 0x23e   :  { %v639_v17 = vadd.f32 %v638_v3, %v570_v42 }
 0x23f   :  { %v709_v24 = vpop.f32.mrf.mxu0 }
 0x240   :  { %v643_v12 = vrot.slane %v639_v17, 7 }
 0x242   :  { %v645_v2 = vsub.f32 %v639_v17, %v643_v12 }
 0x244   :  { %v646_v22 = vsub.f32 0.0, %v645_v2 }
 0x246   :  { %v647_v14 = vmul.f32 1.442695, %v646_v22 }
 0x248   :  { %768 = vpow2.f32 %v647_v14 }
 0x255   :  { %v769_v37 = vpop.eup %768 }
 0x256   :  { %v649_v26 = vadd.f32 1.0, %v769_v37 }
 0x258   :  { %770 = vrcp.f32 %v649_v26 }
 0x265   :  { %v771_v9 = vpop.eup %770 }
 0x266   :  { %v651_v5 = vsub.f32 1.0, %v771_v9  ;;  %653 = vst [vmem:[%s1212_s5] sm:$0x2] %v771_v9 }
 0x268   :  { %652 = vst [vmem:[%s1212_s5 - $0x1] sm:$0x2] %v651_v5 }

</bundles_post_ra>
